<compile_context>
chip_gen: v6e
topology: v6e:2x2x1
jax: 0.10.0
libtpu: 0.0.40
codegen_flags: <defaults>
</compile_context>

<pallas_src>
import functools

import jax
import jax.numpy as jnp
from jax.experimental import pallas as pl
from jax.experimental.pallas import tpu as pltpu


_LANES = 128
_SUBLANES = 8
_MAX_TILE_ROWS = 2048   # rows of 128 px per grid step (~3 MiB f32 in / step)


def _cdiv(a, b):
    return -(-a // b)


def _round_up(a, b):
    return _cdiv(a, b) * b


def _choose_tiling(rows, num_chunks, max_tile_rows=_MAX_TILE_ROWS):
    """Rows-per-tile S (multiple of 8 sublanes) and tiles-per-chunk."""
    rows_per_chunk = max(1, _cdiv(rows, num_chunks))
    nt = max(1, _cdiv(rows_per_chunk, max_tile_rows))
    s = _round_up(_cdiv(rows_per_chunk, nt), _SUBLANES)
    nt = max(1, _cdiv(rows_per_chunk, s))
    return s, nt


def _bce_dice_kernel(gt_ref, logits_ref, out_ref, *, pos_weight):
    # gt_ref:     (1, 1, S, 128) int32 -- class labels; padded pixels carry 0
    # logits_ref: (1, 2, S, 128) float -- raw logits; padded px: x0=+100, x1=-100
    # out_ref:    (1, 4, 1, 128) f32   -- resident per-lane partial sums:
    #     row 0: BCE element sum, row 1: sum(p1), row 2: sum(p1 * [gt==1]),
    #     row 3: count(gt==1).  Cross-lane reduction happens in the epilogue.
    k = pl.program_id(2)

    @pl.when(k == 0)
    def _init():
        out_ref[...] = jnp.zeros_like(out_ref)

    x0 = logits_ref[0, 0].astype(jnp.float32)          # (S, 128)
    x1 = logits_ref[0, 1].astype(jnp.float32)          # (S, 128)
    g = gt_ref[0, 0]                                   # (S, 128) int32

    t1 = g == 1                                        # one-hot class 1
    t1f = t1.astype(jnp.float32)
    t0f = 1.0 - t1f                                    # one-hot class 0

    # ---- BCE with logits on one-hot targets (num_class == 2 branch) ----
    # bce_c = (1 - t_c) * x_c + (1 + (pw - 1) * t_c) * softplus(-x_c)
    # (stable softplus).  Padded pixels contribute exactly 0 by construction.
    sp0 = jnp.maximum(-x0, 0.0) + jnp.log1p(jnp.exp(-jnp.abs(x0)))
    sp1 = jnp.maximum(-x1, 0.0) + jnp.log1p(jnp.exp(-jnp.abs(x1)))
    if pos_weight is None:
        bce = t1f * x0 + sp0 + t0f * x1 + sp1
    else:
        pw = float(pos_weight)
        bce = (t1f * x0 + (1.0 + (pw - 1.0) * t0f) * sp0
               + t0f * x1 + (1.0 + (pw - 1.0) * t1f) * sp1)

    # ---- two-class softmax: P(class 1) = sigmoid(x1 - x0), exact & stable ----
    d = x1 - x0
    e = jnp.exp(-jnp.abs(d))
    r = pl.reciprocal(1.0 + e, approx=False)   # exact; keeps 1e-5 parity w/ ref
    p1 = jnp.where(d >= 0, r, e * r)

    # ---- per-lane partial sums (cross-sublane only; full-vreg-width stores) --
    out_ref[0, 0] += jnp.sum(bce, axis=0, keepdims=True)                  # (1,128)
    out_ref[0, 1] += jnp.sum(p1, axis=0, keepdims=True)
    out_ref[0, 2] += jnp.sum(jnp.where(t1, p1, 0.0), axis=0, keepdims=True)
    out_ref[0, 3] += jnp.sum(t1f, axis=0, keepdims=True)


def bce_with_log_dice_loss(gt, logits, *, smooth=1e-07, class_weight=None,
                           bce_weight=1.0, max_tile_rows=_MAX_TILE_ROWS,
                           num_parallel_chunks=None):
    """JAX/Pallas port of BceWithLogDiceLoss.forward (two-class / C==2 branch).

    gt:     (B, 1, H, W) integer class labels in {0, 1}
    logits: (B, C, H, W) raw logits, C == 2 (BceLoss asserts num_class <= 2)
    """
    B, C, H, W = logits.shape
    assert gt.shape == (B, 1, H, W)
    # TODO(synk): the C == 1 (sigmoid) branch of DiceLossV1/BceLoss is not
    # implemented; this kernel covers the C == 2 (softmax + one-hot BCE) path.
    assert C == 2, "only the two-class (softmax / one-hot BCE) branch is implemented"

    hw = H * W

    # v7x has two TensorCores: give the grid >= 2 parallel slices even if B == 1.
    if num_parallel_chunks is None:
        num_parallel_chunks = 2 if B == 1 else 1
    P = max(1, int(num_parallel_chunks))

    rows = _cdiv(hw, _LANES)
    s, ntc = _choose_tiling(rows, P, max_tile_rows)
    padded_rows = P * ntc * s
    padded_hw = padded_rows * _LANES

    logits_flat = logits.reshape(B, C, hw)
    gt_flat = gt.reshape(B, 1, hw)
    if gt_flat.dtype != jnp.int32:            # int64 / bool / float -> int32
        gt_flat = gt_flat.astype(jnp.int32)

    if padded_hw != hw:
        pad = padded_hw - hw
        # Padded pixels contribute *exactly zero* to every accumulated
        # statistic: gt = 0, x0 = +100, x1 = -100 -> bce = 0 and
        # p1 = sigmoid(-200) = 0 exactly in f32, so no in-kernel mask is needed.
        pad_logits = jnp.concatenate(
            [jnp.full((B, 1, pad), 100.0, logits_flat.dtype),
             jnp.full((B, 1, pad), -100.0, logits_flat.dtype)], axis=1)
        logits_flat = jnp.concatenate([logits_flat, pad_logits], axis=2)
        gt_flat = jnp.concatenate(
            [gt_flat, jnp.zeros((B, 1, pad), jnp.int32)], axis=2)

    logits_2d = logits_flat.reshape(B, C, padded_rows, _LANES)
    gt_2d = gt_flat.reshape(B, 1, padded_rows, _LANES)

    # BceLoss weight handling: a 2-element class_weight -> pos_weight = w[1].
    pos_weight = None
    if class_weight is not None:
        w = class_weight
        if isinstance(w, (list, tuple)) and len(w) == 2:
            w = w[1]
        pos_weight = float(w)

    kernel = functools.partial(_bce_dice_kernel, pos_weight=pos_weight)

    # VMEM budget per step: (C+1) * s * 128 * 4 B ~= 3 MiB at s=2048, x2 for
    # double buffering ~= 6.3 MiB (+ a 2 KiB resident output block) -- well
    # inside the default scoped VMEM limit on v5e/v6e (32 MiB) and v7x (32 MiB).
    out = pl.pallas_call(
        kernel,
        out_shape=jax.ShapeDtypeStruct((B, 4 * P, 1, _LANES), jnp.float32),
        grid_spec=pltpu.PrefetchScalarGridSpec(
            num_scalar_prefetch=0,
            grid=(B, P, ntc),
            in_specs=[
                pl.BlockSpec((1, 1, s, _LANES),
                             lambda b, p, k: (b, 0, p * ntc + k, 0)),
                pl.BlockSpec((1, C, s, _LANES),
                             lambda b, p, k: (b, 0, p * ntc + k, 0)),
            ],
            out_specs=pl.BlockSpec((1, 4, 1, _LANES),
                                   lambda b, p, k: (b, p, 0, 0)),
        ),
        compiler_params=pltpu.CompilerParams(
            dimension_semantics=("parallel", "parallel", "arbitrary")),
    )(gt_2d, logits_2d)

    # ---- tiny per-image epilogue in plain JAX ----
    stats = out.reshape(B, P, 4, _LANES).sum(axis=(1, 3))   # (B, 4)
    bce_sum = stats[:, 0]
    psum1 = stats[:, 1]        # sum of P(class 1) over real pixels
    inter1 = stats[:, 2]       # sum of P(class 1) where gt == 1
    cnt1 = stats[:, 3]         # number of gt == 1 pixels

    n = float(hw)
    cnt0 = n - cnt1
    psum0 = n - psum1                            # p0 = 1 - p1 on real pixels
    inter0 = cnt0 - (psum1 - inter1)             # sum_{gt==0} (1 - p1)

    dice1 = 2.0 * inter1 / (psum1 + cnt1 + smooth)
    dice0 = 2.0 * inter0 / (psum0 + cnt0 + smooth)
    is_pos = cnt1 > 0.0
    dice_sel = jnp.where(is_pos, dice1, dice0)   # mean over [1:] == class 1 (C==2)

    bce_mean = bce_sum / float(C * H * W)
    bce_w = bce_weight / (bce_weight + 1.0)
    dice_w = 1.0 / (bce_weight + 1.0)
    return jnp.mean(bce_mean * bce_w - jnp.log(dice_sel) * dice_w)


def _bce_with_log_dice_loss_ref(gt, logits, smooth=1e-07, class_weight=None,
                                bce_weight=1.0):
    """Pure-JAX reference mirroring the PyTorch module (C == 2 branch)."""
    B, C, H, W = logits.shape
    x = logits.astype(jnp.float32)
    g = gt[:, 0].astype(jnp.int32)                                  # (B, H, W)
    tgt = jnp.transpose(jax.nn.one_hot(g, C, dtype=jnp.float32),
                        (0, 3, 1, 2))                               # (B, C, H, W)

    pos_weight = None
    if class_weight is not None:
        w = class_weight
        if isinstance(w, (list, tuple)) and len(w) == 2:
            w = w[1]
        pos_weight = float(w)
    pw = 1.0 if pos_weight is None else pos_weight

    bce = -(pw * tgt * jax.nn.log_sigmoid(x)
            + (1.0 - tgt) * jax.nn.log_sigmoid(-x))                 # (B, C, H, W)
    bce_mean = jnp.mean(bce, axis=(1, 2, 3))                        # (B,)

    probas = jax.nn.softmax(x, axis=1)
    intersection = jnp.sum(probas * tgt, axis=(2, 3))               # (B, C)
    cardinality = jnp.sum(probas + tgt, axis=(2, 3))                # (B, C)
    dice_coff = 2.0 * intersection / (cardinality + smooth)
    is_pos = jnp.sum(g > 0, axis=(1, 2)) > 0
    dice_sel = jnp.where(is_pos, jnp.mean(dice_coff[:, 1:], axis=1),
                         dice_coff[:, 0])

    bce_w = bce_weight / (bce_weight + 1.0)
    dice_w = 1.0 / (bce_weight + 1.0)
    return jnp.mean(bce_mean * bce_w - jnp.log(dice_sel) * dice_w)


if __name__ == "__main__":
    key = jax.random.PRNGKey(0)

    # ---- test 1: B = 2, default weights ----
    B, C, H, W = 2, 2, 16, 16
    k_logits, k_gt, k2 = jax.random.split(key, 3)
    logits = jax.random.normal(k_logits, (B, C, H, W), dtype=jnp.float32)
    gt = jax.random.randint(k_gt, (B, 1, H, W), 0, C, dtype=jnp.int32)
    gt = gt.at[1].set(0)   # all-background image -> exercises is_pos == False

    out = jax.block_until_ready(bce_with_log_dice_loss(gt, logits))
    ref = jax.block_until_ready(_bce_with_log_dice_loss_ref(gt, logits))
    assert jnp.allclose(out, ref, atol=1e-5, rtol=1e-5), (out, ref)

    # ---- test 2: B = 1 (parallel pixel-chunk path), pos_weight + bce_weight --
    kl2, kg2 = jax.random.split(k2)
    logits1 = jax.random.normal(kl2, (1, 2, 16, 16), dtype=jnp.float32)
    gt1 = jax.random.randint(kg2, (1, 1, 16, 16), 0, 2, dtype=jnp.int32)
    out1 = jax.block_until_ready(
        bce_with_log_dice_loss(gt1, logits1, class_weight=[1.0, 3.0],
                               bce_weight=0.7))
    ref1 = jax.block_until_ready(
        _bce_with_log_dice_loss_ref(gt1, logits1, class_weight=[1.0, 3.0],
                                    bce_weight=0.7))
    assert jnp.allclose(out1, ref1, atol=1e-5, rtol=1e-5), (out1, ref1)

    print("KERNEL_OK")
</pallas_src>

<mosaic_0001>
module attributes {stable_mosaic.version = 11 : i64} {
  func.func @_bce_dice_kernel(%arg0: i32, %arg1: i32, %arg2: i32, %arg3: memref<1x1x8x128xi32, #tpu.memory_space<vmem>>, %arg4: memref<1x2x8x128xf32, #tpu.memory_space<vmem>>, %arg5: memref<1x4x1x128xf32, #tpu.memory_space<vmem>>) attributes {dimension_semantics = [#tpu.dimension_semantics<parallel>, #tpu.dimension_semantics<parallel>, #tpu.dimension_semantics<arbitrary>], iteration_bounds = array<i64: 2, 1, 1>, scalar_prefetch = 0 : i64, scratch_operands = 0 : i64, tpu.core_type = #tpu.core_type<tc>, window_params = [{transform_indices = @transform_0, window_bounds = array<i64: 1, 1, 8, 128>}, {transform_indices = @transform_1, window_bounds = array<i64: 1, 2, 8, 128>}, {transform_indices = @transform_2, window_bounds = array<i64: 1, 4, 1, 128>}]} {
    %c0_i32 = arith.constant 0 : i32
    %0 = arith.cmpi eq, %arg2, %c0_i32 : i32
    %1 = arith.extui %0 : i1 to i32
    %c0_i32_0 = arith.constant 0 : i32
    %2 = arith.cmpi ne, %1, %c0_i32_0 : i32
    scf.if %2 {
      %cst_55 = arith.constant 0.000000e+00 : f32
      %86 = vector.broadcast %cst_55 : f32 to vector<1x4x1x128xf32>
      %c0_56 = arith.constant 0 : index
      %c0_57 = arith.constant 0 : index
      %c0_58 = arith.constant 0 : index
      %c0_59 = arith.constant 0 : index
      %87 = vector.load %arg5[%c0_56, %c0_57, %c0_58, %c0_59] : memref<1x4x1x128xf32, #tpu.memory_space<vmem>>, vector<1x4x1x128xf32>
      tpu.vector_store %arg5[%c0_56, %c0_57, %c0_58, %c0_59], %86 {strides = array<i32>} : memref<1x4x1x128xf32, #tpu.memory_space<vmem>>, vector<1x4x1x128xf32>,
    } else {
    }
    %c0 = arith.constant 0 : index
    %c0_1 = arith.constant 0 : index
    %c0_2 = arith.constant 0 : index
    %c0_3 = arith.constant 0 : index
    %3 = vector.load %arg4[%c0, %c0_1, %c0_2, %c0_3] : memref<1x2x8x128xf32, #tpu.memory_space<vmem>>, vector<1x1x8x128xf32>
    %4 = vector.shape_cast %3 : vector<1x1x8x128xf32> to vector<8x128xf32>
    %c0_4 = arith.constant 0 : index
    %c1 = arith.constant 1 : index
    %c0_5 = arith.constant 0 : index
    %c0_6 = arith.constant 0 : index
    %5 = vector.load %arg4[%c0_4, %c1, %c0_5, %c0_6] : memref<1x2x8x128xf32, #tpu.memory_space<vmem>>, vector<1x1x8x128xf32>
    %6 = vector.shape_cast %5 : vector<1x1x8x128xf32> to vector<8x128xf32>
    %c0_7 = arith.constant 0 : index
    %c0_8 = arith.constant 0 : index
    %c0_9 = arith.constant 0 : index
    %c0_10 = arith.constant 0 : index
    %7 = vector.load %arg3[%c0_7, %c0_8, %c0_9, %c0_10] : memref<1x1x8x128xi32, #tpu.memory_space<vmem>>, vector<1x1x8x128xi32>
    %8 = vector.shape_cast %7 : vector<1x1x8x128xi32> to vector<8x128xi32>
    %c1_i32 = arith.constant 1 : i32
    %9 = vector.broadcast %c1_i32 : i32 to vector<8x128xi32>
    %10 = arith.cmpi eq, %8, %9 : vector<8x128xi32>
    %11 = arith.extui %10 : vector<8x128xi1> to vector<8x128xi32>
    %12 = arith.sitofp %11 : vector<8x128xi32> to vector<8x128xf32>
    %cst = arith.constant 1.000000e+00 : f32
    %13 = vector.broadcast %cst : f32 to vector<8x128xf32>
    %14 = arith.subf %13, %12 : vector<8x128xf32>
    %cst_11 = arith.constant 0.000000e+00 : f32
    %15 = vector.broadcast %cst_11 : f32 to vector<8x128xf32>
    %16 = arith.subf %15, %4 : vector<8x128xf32>
    %cst_12 = arith.constant 0.000000e+00 : f32
    %17 = vector.broadcast %cst_12 : f32 to vector<8x128xf32>
    %18 = arith.maximumf %16, %17 : vector<8x128xf32>
    %19 = math.absf %4 : vector<8x128xf32>
    %cst_13 = arith.constant 0.000000e+00 : f32
    %20 = vector.broadcast %cst_13 : f32 to vector<8x128xf32>
    %21 = arith.subf %20, %19 : vector<8x128xf32>
    %22 = math.exp %21 : vector<8x128xf32>
    %23 = math.log1p %22 : vector<8x128xf32>
    %24 = arith.addf %18, %23 : vector<8x128xf32>
    %cst_14 = arith.constant 0.000000e+00 : f32
    %25 = vector.broadcast %cst_14 : f32 to vector<8x128xf32>
    %26 = arith.subf %25, %6 : vector<8x128xf32>
    %cst_15 = arith.constant 0.000000e+00 : f32
    %27 = vector.broadcast %cst_15 : f32 to vector<8x128xf32>
    %28 = arith.maximumf %26, %27 : vector<8x128xf32>
    %29 = math.absf %6 : vector<8x128xf32>
    %cst_16 = arith.constant 0.000000e+00 : f32
    %30 = vector.broadcast %cst_16 : f32 to vector<8x128xf32>
    %31 = arith.subf %30, %29 : vector<8x128xf32>
    %32 = math.exp %31 : vector<8x128xf32>
    %33 = math.log1p %32 : vector<8x128xf32>
    %34 = arith.addf %28, %33 : vector<8x128xf32>
    %35 = arith.mulf %12, %4 : vector<8x128xf32>
    %36 = arith.addf %35, %24 : vector<8x128xf32>
    %37 = arith.mulf %14, %6 : vector<8x128xf32>
    %38 = arith.addf %36, %37 : vector<8x128xf32>
    %39 = arith.addf %38, %34 : vector<8x128xf32>
    %40 = arith.subf %6, %4 : vector<8x128xf32>
    %41 = math.absf %40 : vector<8x128xf32>
    %cst_17 = arith.constant 0.000000e+00 : f32
    %42 = vector.broadcast %cst_17 : f32 to vector<8x128xf32>
    %43 = arith.subf %42, %41 : vector<8x128xf32>
    %44 = math.exp %43 : vector<8x128xf32>
    %cst_18 = arith.constant 1.000000e+00 : f32
    %45 = vector.broadcast %cst_18 : f32 to vector<8x128xf32>
    %46 = arith.addf %45, %44 : vector<8x128xf32>
    %47 = tpu.reciprocal %46 : vector<8x128xf32> -> vector<8x128xf32>
    %cst_19 = arith.constant 0.000000e+00 : f32
    %48 = vector.broadcast %cst_19 : f32 to vector<8x128xf32>
    %49 = arith.cmpf oge, %40, %48 : vector<8x128xf32>
    %50 = arith.mulf %44, %47 : vector<8x128xf32>
    %51 = arith.select %49, %47, %50 : vector<8x128xi1>, vector<8x128xf32>
    %c0_20 = arith.constant 0 : index
    %c0_21 = arith.constant 0 : index
    %c0_22 = arith.constant 0 : index
    %c0_23 = arith.constant 0 : index
    %52 = vector.load %arg5[%c0_20, %c0_21, %c0_22, %c0_23] : memref<1x4x1x128xf32, #tpu.memory_space<vmem>>, vector<1x1x1x128xf32>
    %53 = vector.shape_cast %52 : vector<1x1x1x128xf32> to vector<1x128xf32>
    %cst_24 = arith.constant dense<0.000000e+00> : vector<128xf32>
    %54 = vector.multi_reduction <add>, %39, %cst_24 [0] : vector<8x128xf32> to vector<128xf32>
    %55 = vector.shape_cast %54 : vector<128xf32> to vector<1x128xf32>
    %56 = arith.addf %53, %55 : vector<1x128xf32>
    %c0_25 = arith.constant 0 : index
    %c0_26 = arith.constant 0 : index
    %c0_27 = arith.constant 0 : index
    %c0_28 = arith.constant 0 : index
    %57 = vector.load %arg5[%c0_25, %c0_26, %c0_27, %c0_28] : memref<1x4x1x128xf32, #tpu.memory_space<vmem>>, vector<1x1x1x128xf32>
    %58 = vector.shape_cast %57 : vector<1x1x1x128xf32> to vector<1x128xf32>
    %59 = vector.shape_cast %56 : vector<1x128xf32> to vector<1x1x1x128xf32>
    tpu.vector_store %arg5[%c0_25, %c0_26, %c0_27, %c0_28], %59 {strides = array<i32>} : memref<1x4x1x128xf32, #tpu.memory_space<vmem>>, vector<1x1x1x128xf32>,
    %c0_29 = arith.constant 0 : index
    %c1_30 = arith.constant 1 : index
    %c0_31 = arith.constant 0 : index
    %c0_32 = arith.constant 0 : index
    %60 = vector.load %arg5[%c0_29, %c1_30, %c0_31, %c0_32] : memref<1x4x1x128xf32, #tpu.memory_space<vmem>>, vector<1x1x1x128xf32>
    %61 = vector.shape_cast %60 : vector<1x1x1x128xf32> to vector<1x128xf32>
    %cst_33 = arith.constant dense<0.000000e+00> : vector<128xf32>
    %62 = vector.multi_reduction <add>, %51, %cst_33 [0] : vector<8x128xf32> to vector<128xf32>
    %63 = vector.shape_cast %62 : vector<128xf32> to vector<1x128xf32>
    %64 = arith.addf %61, %63 : vector<1x128xf32>
    %c0_34 = arith.constant 0 : index
    %c1_35 = arith.constant 1 : index
    %c0_36 = arith.constant 0 : index
    %c0_37 = arith.constant 0 : index
    %65 = vector.load %arg5[%c0_34, %c1_35, %c0_36, %c0_37] : memref<1x4x1x128xf32, #tpu.memory_space<vmem>>, vector<1x1x1x128xf32>
    %66 = vector.shape_cast %65 : vector<1x1x1x128xf32> to vector<1x128xf32>
    %67 = vector.shape_cast %64 : vector<1x128xf32> to vector<1x1x1x128xf32>
    tpu.vector_store %arg5[%c0_34, %c1_35, %c0_36, %c0_37], %67 {strides = array<i32>} : memref<1x4x1x128xf32, #tpu.memory_space<vmem>>, vector<1x1x1x128xf32>,
    %c0_38 = arith.constant 0 : index
    %c2 = arith.constant 2 : index
    %c0_39 = arith.constant 0 : index
    %c0_40 = arith.constant 0 : index
    %68 = vector.load %arg5[%c0_38, %c2, %c0_39, %c0_40] : memref<1x4x1x128xf32, #tpu.memory_space<vmem>>, vector<1x1x1x128xf32>
    %69 = vector.shape_cast %68 : vector<1x1x1x128xf32> to vector<1x128xf32>
    %cst_41 = arith.constant 0.000000e+00 : f32
    %70 = vector.broadcast %cst_41 : f32 to vector<8x128xf32>
    %71 = arith.select %10, %51, %70 : vector<8x128xi1>, vector<8x128xf32>
    %cst_42 = arith.constant dense<0.000000e+00> : vector<128xf32>
    %72 = vector.multi_reduction <add>, %71, %cst_42 [0] : vector<8x128xf32> to vector<128xf32>
    %73 = vector.shape_cast %72 : vector<128xf32> to vector<1x128xf32>
    %74 = arith.addf %69, %73 : vector<1x128xf32>
    %c0_43 = arith.constant 0 : index
    %c2_44 = arith.constant 2 : index
    %c0_45 = arith.constant 0 : index
    %c0_46 = arith.constant 0 : index
    %75 = vector.load %arg5[%c0_43, %c2_44, %c0_45, %c0_46] : memref<1x4x1x128xf32, #tpu.memory_space<vmem>>, vector<1x1x1x128xf32>
    %76 = vector.shape_cast %75 : vector<1x1x1x128xf32> to vector<1x128xf32>
    %77 = vector.shape_cast %74 : vector<1x128xf32> to vector<1x1x1x128xf32>
    tpu.vector_store %arg5[%c0_43, %c2_44, %c0_45, %c0_46], %77 {strides = array<i32>} : memref<1x4x1x128xf32, #tpu.memory_space<vmem>>, vector<1x1x1x128xf32>,
    %c0_47 = arith.constant 0 : index
    %c3 = arith.constant 3 : index
    %c0_48 = arith.constant 0 : index
    %c0_49 = arith.constant 0 : index
    %78 = vector.load %arg5[%c0_47, %c3, %c0_48, %c0_49] : memref<1x4x1x128xf32, #tpu.memory_space<vmem>>, vector<1x1x1x128xf32>
    %79 = vector.shape_cast %78 : vector<1x1x1x128xf32> to vector<1x128xf32>
    %cst_50 = arith.constant dense<0.000000e+00> : vector<128xf32>
    %80 = vector.multi_reduction <add>, %12, %cst_50 [0] : vector<8x128xf32> to vector<128xf32>
    %81 = vector.shape_cast %80 : vector<128xf32> to vector<1x128xf32>
    %82 = arith.addf %79, %81 : vector<1x128xf32>
    %c0_51 = arith.constant 0 : index
    %c3_52 = arith.constant 3 : index
    %c0_53 = arith.constant 0 : index
    %c0_54 = arith.constant 0 : index
    %83 = vector.load %arg5[%c0_51, %c3_52, %c0_53, %c0_54] : memref<1x4x1x128xf32, #tpu.memory_space<vmem>>, vector<1x1x1x128xf32>
    %84 = vector.shape_cast %83 : vector<1x1x1x128xf32> to vector<1x128xf32>
    %85 = vector.shape_cast %82 : vector<1x128xf32> to vector<1x1x1x128xf32>
    tpu.vector_store %arg5[%c0_51, %c3_52, %c0_53, %c0_54], %85 {strides = array<i32>} : memref<1x4x1x128xf32, #tpu.memory_space<vmem>>, vector<1x1x1x128xf32>,
    return
  }
  func.func @transform_0(%arg0: i32, %arg1: i32, %arg2: i32) -> (i32, i32, i32, i32) {
    %c1_i32 = arith.constant 1 : i32
    %0 = arith.muli %arg1, %c1_i32 : i32
    %1 = arith.addi %0, %arg2 : i32
    %c0_i32 = arith.constant 0 : i32
    %c0_i32_0 = arith.constant 0 : i32
    %c0_i32_1 = arith.constant 0 : i32
    return %arg0, %c0_i32, %1, %c0_i32_0 : i32, i32, i32, i32
  }
  func.func @transform_1(%arg0: i32, %arg1: i32, %arg2: i32) -> (i32, i32, i32, i32) {
    %c1_i32 = arith.constant 1 : i32
    %0 = arith.muli %arg1, %c1_i32 : i32
    %1 = arith.addi %0, %arg2 : i32
    %c0_i32 = arith.constant 0 : i32
    %c0_i32_0 = arith.constant 0 : i32
    %c0_i32_1 = arith.constant 0 : i32
    return %arg0, %c0_i32, %1, %c0_i32_0 : i32, i32, i32, i32
  }
  func.func @transform_2(%arg0: i32, %arg1: i32, %arg2: i32) -> (i32, i32, i32, i32) {
    %c0_i32 = arith.constant 0 : i32
    %c0_i32_0 = arith.constant 0 : i32
    %c0_i32_1 = arith.constant 0 : i32
    return %arg0, %arg1, %c0_i32, %c0_i32_0 : i32, i32, i32, i32
  }
}

</mosaic_0001>

<bundles_post_ra>
// kernel: tpu_custom_call.1
= control target key start
LH: loop header
LB: loop body
LE: loop exit
PB: predicated region body
PF: predicated region fallthrough
CT: control target
= control target key end

     0   :  { %7 = vsyncpa [#allocation3], 0  ;;  %s947_s0 = inlined_call_operand.hbm [shape: s32[2,1,8,128], index: 0, kind: input, shape index: {}]   ;;  %s948_s1 = inlined_call_operand.hbm [shape: f32[2,2,8,128], index: 1, kind: input, shape index: {}]   ;;  %s949_s2 = inlined_call_operand.hbm [shape: f32[2,4,1,128], index: 2, kind: output, shape index: {}]  }
   0x1   :  { %9 = vsyncpa [#allocation3 + $0x1], 0 }
   0x2   :  { %10 = vsyncpa [#allocation6], 0 }
   0x3   :  { %12 = vsyncpa [#allocation6 + $0x1], 0 }
   0x4   :  { %13 = vsyncpa [#allocation4], 0 }
   0x5   :  { %15 = vsyncpa [#allocation4 + $0x1], 0  ;;  %s746_s9 = smov 0   ;;  %s748_s10 = smov 0  }
   0x6   :  { %s750_s11 = smov 0   ;;  %s752_s12 = smov 0  }
   0x7   :  { %s754_s13 = smov 0   ;;  %s756_s14 = smov 0  }
   0x8 LB: > { %s469_s15 = sadd.s32 4294967295, %s721_s14   ;;  %s470_s16 = sadd.s32 4294967294, %s721_s14   ;;  %s721_s14 = sphi %s756_s14, %s21_s14   ;;  %s717_s13 = sphi %s754_s13, %s961_s13   ;;  %s713_s12 = sphi %s752_s12, %s960_s12   ;;  %s709_s11 = sphi %s750_s11, %s959_s11   ;;  %s705_s10 = sphi %s748_s10, %s958_s10   ;;  %s701_s9 = sphi %s746_s9, %s957_s9  }
   0x9   : > { %s40_s17 = sadd.s32 1, %s717_s13  ;;  %s51_s18 = sadd.s32 1, %s709_s11 }
   0xa   : > { %p42_p0 = scmp.ge.s32.totalorder %s40_s17, 2  ;;  %p58_p1 = scmp.ne.s32.totalorder %s709_s11, %s705_s10 }
   0xb   : > { %p59_p2 = scmp.eq.s32.totalorder %s721_s14, 0  ;;  %p64_p3 = scmp.ne.s32.totalorder %s705_s10, %s701_s9 }
   0xc   : > { %s963_s17 = smov (%p42_p0, %s40_s17), 0  ;;  %p65_p5 = scmp.eq.s32.totalorder %s469_s15, 0 }
   0xd   : > { %p787_p4 = por %p59_p2, %p58_p1  ;;  %s46_s20 = ssub.s32 %s717_s13, %s963_s17 }
   0xe   : > { %p120_p6 = scmp.eq.s32.totalorder %s469_s15, 1  ;;  %p49_p7 = scmp.eq.s32.totalorder %s46_s20, 0 }
   0xf   : > { %p793_p8 = por %p65_p5, %p64_p3  ;;  %p126_p10 = scmp.eq.s32.totalorder %s470_s16, 1 }
  0x10   : > { %p797_p9 = por %p120_p6, %p58_p1  ;;  %p514_p13 = scmp.lt.s32.totalorder %s721_s14, 2 }
  0x11   : > { %s802_s23 = scalar_select %p49_p7, %s709_s11, %s51_s18  }
  0x12   : > { %p804_p11 = por %p126_p10, %p64_p3  ;;  %s811_s25 = sand.u32 1, %s709_s11  }
  0x13   : > { %s473_s26 = sshll.u32 %s811_s25, 3  ;;  %s474_s27 = sshll.u32 %s717_s13, 7 }
  0x14   : > { %s157_s30 = scalar_lea.hbm %s947_s0, %s474_s27  ;;  %s150_s3 = scalar_lea.vmem [#allocation2], %s473_s26 }
  0x15   : > { %s159_s4 = sshll.u32 %s150_s3, 4  ;;  %p820_p0 = pnand %p514_p13, %p787_p4  ;;  %s160_s4 = int_to_ptr.vmem [resolvable:$true] %s159_s4 }
  0x16   : > { %p478_p1 = scmp.ge.s32.totalorder %s721_s14, 1  ;;  %p187_p2 = scmp.lt.s32.totalorder %s721_s14, 3 }
  0x17   : > { %s147_s6 = scalar_lea.sflag [#allocation3], %s811_s25  ;;  %p583_p3 = pneg %p820_p0 }
  0x18   : > { %s594_s7 = scalar_lea.vmem %s160_s4, 128  ;;  %s723_s8 = smov [#allocation2]  }
  0x19   : > { %p595_p5 = scmp.ne.s32.totalorder %s160_s4, %s594_s7  ;;  %s599_s15 = sshll.u32 %s723_s8, 4  ;;  %s600_s15 = int_to_ptr.vmem [resolvable:$false] %s599_s15 }
  0x1a   : > { %s601_s16 = scalar_lea.vmem %s600_s15, 256  ;;  %p602_p4 = scmp.lt.s32.totalorder %s160_s4, %s600_s15 }
  0x1b   : > { %p597_p6 = pnand %p595_p5, %p583_p3  ;;  %p603_p10 = scmp.lt.s32.totalorder %s601_s16, %s594_s7 }
  0x1d   : > { %p598_p7 = pneg %p597_p6  ;;  %p604_p13 = por %p603_p10, %p602_p4 }
  0x1f   : > { %p605_p12 = pnand %p604_p13, %p598_p7 }
  0x21   : > { %608 = shalt.err (!%p605_p12)
}
  0x22   : > { %506 = dma.hbm_to_vmem [thread:$0]  (!%p820_p0), %s157_s30, 128, %s160_s4, %s147_s6  }
  0x23   : > { %p838_p5 = pnand %p478_p1, %p187_p2  ;;  %s475_s19 = sshll.u32 %s811_s25, 4 }
  0x24   : > { %s495_s20 = sshll.u32 %s717_s13, 8  ;;  %s170_s29 = scalar_lea.vmem [#allocation5], %s475_s19 }
  0x25   : > { %s178_s28 = scalar_lea.hbm %s948_s1, %s495_s20  ;;  %s179_s3 = sshll.u32 %s170_s29, 4  ;;  %s180_s3 = int_to_ptr.vmem [resolvable:$true] %s179_s3 }
  0x26   : > { %s167_s7 = scalar_lea.sflag [#allocation6], %s811_s25  ;;  %s622_s8 = scalar_lea.vmem %s180_s3, 256 }
  0x27   : > { %p623_p12 = scmp.ne.s32.totalorder %s180_s3, %s622_s8  ;;  %s724_s30 = smov [#allocation5]  }
  0x28   : > { %s627_s4 = sshll.u32 %s724_s30, 4  ;;  %s628_s4 = int_to_ptr.vmem [resolvable:$false] %s627_s4 }
  0x29   : > { %p625_p6 = pnand %p623_p12, %p583_p3  ;;  %s629_s6 = scalar_lea.vmem %s628_s4, 512 }
  0x2a   : > { %p630_p1 = scmp.lt.s32.totalorder %s180_s3, %s628_s4  ;;  %p631_p2 = scmp.lt.s32.totalorder %s629_s6, %s622_s8 }
  0x2b   : > { %p626_p7 = pneg %p625_p6 }
  0x2c   : > { %p632_p4 = por %p631_p2, %p630_p1 }
  0x2e   : > { %p633_p10 = pnand %p632_p4, %p626_p7 }
  0x30   : > { %636 = shalt.err (!%p633_p10)
}
  0x31   : > { %s725_s15 = smov 128   ;;  %s726_s16 = smov 8  }
  0x32   : > { %509 = dma.hbm_to_vmem [thread:$0]  (!%p820_p0), %s178_s28, 256, %s180_s3, %s167_s7, %s725_s15, %s725_s15, %s726_s16  }
  0x33   : > { %191 = sbr.rel (%p838_p5) target bundleno = 136 (0x88), region = 28  ;;  %s856_s25 = sand.u32 (!%p838_p5), 1, %s705_s10  }
  0x34   : > { %s479_s19 = sshll.u32 (!%p838_p5), %s856_s25, 3  ;;  %s194_s20 = scalar_lea.sflag (!%p838_p5), [#allocation3], %s856_s25 }
  0x35   : > { %s197_s26 = scalar_lea.vmem (!%p838_p5), [#allocation2], %s479_s19 }
  0x38   : > { %688 = dma.done.wait (%p793_p8), %s194_s20, 128  }
  0x39   : > { %690 = vsyncadd (%p793_p8), %s194_s20, 4294967168  ;;  %s480_s5 = sshll.u32 %s856_s25, 4  ;;  %s203_s18 = scalar_lea.sflag [#allocation6], %s856_s25 }
  0x3a   : > { %s206_s27 = scalar_lea.vmem [#allocation5], %s480_s5 }
  0x3b   : > { %692 = dma.done.wait (%p793_p8), %s203_s18, 256  }
  0x3c   : > { %694 = vsyncadd (%p793_p8), %s203_s18, 4294967040  ;;  %s481_s28 = sshll.u32 %s856_s25, 2  ;;  %v727_v0 = vmov 0.0   ;;  %v243_v1 = vld [vmem:[%s206_s27] sm:$0xff]  ;;  %v482_v2 = vld [vmem:[%s206_s27 + $0x8] sm:$0xff]  ;;  %s496_s21 = sshll.u32 %s713_s12, 6 }
  0x3d   : > { %s871_s29 = scalar_lea.vmem [#allocation7], %s481_s28  ;;  %v877_v3 = vld [vmem:[%s197_s26] sm:$0xff]  ;;  %v253_v4 = vand.u32 2147483647, %v243_v1  ;;  %v269_v5 = vand.u32 2147483647, %v482_v2  ;;  %v288_v6 = vsub.f32 %v482_v2, %v243_v1  ;;  %s896_s30 = scalar_lea.hbm %s949_s2, %s496_s21 }
  0x3e   : > { %239 = vst [vmem:[%s871_s29] sm:$0x1] %v727_v0  ;;  %240 = vst [vmem:[%s871_s29 + $0x1] sm:$0x1] %v727_v0  ;;  %vm247_vm0 = vcmp.eq.s32.totalorder %v877_v3, 1  ;;  %v251_v32 = vsub.f32 0.0, %v243_v1  ;;  %v267_v36 = vsub.f32 0.0, %v482_v2 }
  0x3f   : > { %241 = vst [vmem:[%s871_s29 + $0x2] sm:$0x1] %v727_v0  ;;  %242 = vst [vmem:[%s871_s29 + $0x3] sm:$0x1] %v727_v0  ;;  %v254_v7 = vsub.f32 0.0, %v253_v4  ;;  %v270_v8 = vsub.f32 0.0, %v269_v5 }
  0x40   : > { %v483_v9 = vsel %vm247_vm0, 1.0, %v727_v0  ;;  %v289_v10 = vand.u32 2147483647, %v288_v6  ;;  %v252_v40 = vmax.f32 %v251_v32, 0.0  ;;  %v268_v45 = vmax.f32 %v267_v36, 0.0  ;;  %s354_s3 = sshll.u32 %s871_s29, 4  ;;  %s898_s3 = int_to_ptr.vmem [resolvable:$true] %s354_s3 }
  0x41   : > { %v255_v11 = vmul.f32 1.442695, %v254_v7  ;;  %v271_v12 = vmul.f32 1.442695, %v270_v8  ;;  %v330_v13 = vrot.slane %v483_v9, 4  ;;  %v250_v39 = vsub.f32 1.0, %v483_v9 }
  0x42   : > { %v290_v14 = vsub.f32 0.0, %v289_v10  ;;  %v283_v44 = vmul.f32 %v483_v9, %v243_v1  ;;  %vm295_vm3 = vcmp.ge.f32.partialorder %v288_v6, 0.0  ;;  %s339_s4 = scalar_lea.sflag [#allocation4], %s856_s25  ;;  %s637_s6 = scalar_lea.vmem %s898_s3, 64 }
  0x43   : > { %569 = vpow2.f32 %v255_v11  ;;  %v331_v15 = vadd.f32 %v483_v9, %v330_v13  ;;  %v285_v50 = vmul.f32 %v482_v2, %v250_v39  ;;  %p638_p8 = scmp.ne.s32.totalorder %s898_s3, %s637_s6  ;;  %s728_s12 = smov [#allocation7]  }
  0x44   : > { %571 = vpow2.f32 %v271_v12  ;;  %v291_v16 = vmul.f32 1.442695, %v290_v14  ;;  %s641_s15 = sshll.u32 %s728_s12, 4  ;;  %s642_s15 = int_to_ptr.vmem [resolvable:$false] %s641_s15 }
  0x45   : > { %v332_v17 = vrot.slane %v331_v15, 2  ;;  %v484_v7 = vld [vmem:[%s871_s29 + $0x1] sm:$0x1]  ;;  %p639_p0 = pnand %p638_p8, %p797_p9  ;;  %s643_s16 = scalar_lea.vmem %s642_s15, 128 }
  0x46   : > { %573 = vpow2.f32 %v291_v16  ;;  %v488_v20 = vld [vmem:[%s871_s29 + $0x3] sm:$0x1]  ;;  %v486_v10 = vld [vmem:[%s871_s29 + $0x2] sm:$0x1]  ;;  %v298_v16 = vld [vmem:[%s871_s29] sm:$0x1]  ;;  %p644_p13 = scmp.lt.s32.totalorder %s898_s3, %s642_s15  ;;  %p645_p5 = scmp.lt.s32.totalorder %s643_s16, %s637_s6 }
  0x47   : > { %v333_v18 = vadd.f32 %v332_v17, %v331_v15  ;;  %p640_p3 = pneg %p639_p0 }
  0x48   : > { %p646_p12 = por %p645_p5, %p644_p13 }
  0x49   : > { %v334_v19 = vrot.slane %v333_v18, 1 }
  0x4a   : > { %p647_p6 = pnand %p646_p12, %p640_p3 }
  0x4b   : > { %v335_v21 = vadd.f32 %v334_v19, %v333_v18 }
  0x4d   : > { %v336_v22 = vadd.f32 %v488_v20, %v335_v21 }
  0x4f   : > { %489 = vst [vmem:[%s871_s29 + $0x3] sm:$0x1] %v336_v22 }
  0x50   : > { %v570_v23 = vpop.eup %569 }
  0x51   : > { %v572_v24 = vpop.eup %571  ;;  %v257_v25 = vadd.f32 1.0, %v570_v23  ;;  %v260_v29 = vmul.f32 -0.5, %v570_v23  ;;  %v263_v33 = vand.u32 2147483647, %v570_v23 }
  0x52   : > { %v273_v26 = vadd.f32 1.0, %v572_v24  ;;  %v276_v30 = vmul.f32 -0.5, %v572_v24  ;;  %v279_v35 = vand.u32 2147483647, %v572_v24 }
  0x53   : > { %v574_v27 = vpop.eup %573  ;;  %575 = vlog2.f32 %v257_v25  ;;  %v261_v31 = vadd.f32 1.0, %v260_v29  ;;  %vm264_vm1 = vcmp.lt.f32.partialorder %v263_v33, 0.0004427343 }
  0x54   : > { %577 = vlog2.f32 %v273_v26  ;;  %v293_v28 = vadd.f32 1.0, %v574_v27  ;;  %v277_v34 = vadd.f32 1.0, %v276_v30  ;;  %vm280_vm2 = vcmp.lt.f32.partialorder %v279_v35, 0.0004427343 }
  0x55   : > { %v262_v37 = vmul.f32 %v570_v23, %v261_v31 }
  0x56   : > { %579 = vrcp.f32 %v293_v28  ;;  %v278_v41 = vmul.f32 %v572_v24, %v277_v34 }
  0x60   : > { %v576_v38 = vpop.eup %575 }
  0x61   : > { %v578_v42 = vpop.eup %577  ;;  %v259_v43 = vmul.f32 0.6931472, %v576_v38 }
  0x62   : > { %v275_v46 = vmul.f32 0.6931472, %v578_v42 }
  0x63   : > { %v580_v47 = vpop.eup %579  ;;  %v265_v48 = vsel %vm264_vm1, %v262_v37, %v259_v43 }
  0x64   : > { %v266_v49 = vadd.f32 %v265_v48, %v252_v40  ;;  %v281_v51 = vsel %vm280_vm2, %v278_v41, %v275_v46  ;;  %v296_v52 = vmul.f32 %v580_v47, %v574_v27 }
  0x65   : > { %v282_v54 = vadd.f32 %v281_v51, %v268_v45 }
  0x66   : > { %v284_v53 = vadd.f32 %v283_v44, %v266_v49  ;;  %v297_v55 = vsel %vm295_vm3, %v580_v47, %v296_v52 }
  0x67   : > { %v309_v56 = vrot.slane %v297_v55, 4  ;;  %v319_v57 = vsel %vm247_vm0, %v297_v55, 0.0 }
  0x68   : > { %v286_v58 = vadd.f32 %v285_v50, %v284_v53  ;;  %v320_v59 = vrot.slane %v319_v57, 4 }
  0x69   : > { %v310_v60 = vadd.f32 %v309_v56, %v297_v55 }
  0x6a   : > { %v287_v61 = vadd.f32 %v286_v58, %v282_v54  ;;  %v321_v62 = vadd.f32 %v320_v59, %v319_v57 }
  0x6b   : > { %v311_v63 = vrot.slane %v310_v60, 2 }
  0x6c   : > { %v299_v0 = vrot.slane %v287_v61, 4  ;;  %v322_v1 = vrot.slane %v321_v62, 2 }
  0x6d   : > { %v312_v2 = vadd.f32 %v311_v63, %v310_v60 }
  0x6e   : > { %v300_v4 = vadd.f32 %v299_v0, %v287_v61  ;;  %v323_v5 = vadd.f32 %v322_v1, %v321_v62 }
  0x6f   : > { %v313_v6 = vrot.slane %v312_v2, 1 }
  0x70   : > { %v301_v3 = vrot.slane %v300_v4, 2  ;;  %v324_v8 = vrot.slane %v323_v5, 1 }
  0x71   : > { %v314_v9 = vadd.f32 %v313_v6, %v312_v2 }
  0x72   : > { %v302_v11 = vadd.f32 %v301_v3, %v300_v4  ;;  %v325_v12 = vadd.f32 %v324_v8, %v323_v5 }
  0x73   : > { %v315_v13 = vadd.f32 %v484_v7, %v314_v9 }
  0x74   : > { %v303_v14 = vrot.slane %v302_v11, 1  ;;  %v326_v15 = vadd.f32 %v486_v10, %v325_v12 }
  0x75   : > { %485 = vst [vmem:[%s871_s29 + $0x1] sm:$0x1] %v315_v13 }
  0x76   : > { %v304_v17 = vadd.f32 %v303_v14, %v302_v11  ;;  %487 = vst [vmem:[%s871_s29 + $0x2] sm:$0x1] %v326_v15 }
  0x78   : > { %v305_v18 = vadd.f32 %v304_v17, %v298_v16 }
  0x7a   : > { %306 = vst [vmem:[%s871_s29] sm:$0x1] %v305_v18 }
  0x7b   : > { %650 = shalt.err (!%p647_p6)
}
  0x7c   : > { %s651_s19 = scalar_lea.hbm %s896_s30, 64  ;;  %s655_s5 = scalar_lea.hbm %s949_s2, 128 }
  0x7d   : > { %p652_p7 = scmp.ne.s32.totalorder %s896_s30, %s651_s19  ;;  %p656_p4 = scmp.lt.s32.totalorder %s896_s30, %s949_s2 }
  0x7e   : > { %p657_p10 = scmp.lt.s32.totalorder %s655_s5, %s651_s19 }
  0x7f   : > { %p653_p1 = pnand %p652_p7, %p797_p9 }
  0x80   : > { %p658_p8 = por %p657_p10, %p656_p4 }
  0x81   : > { %p654_p2 = pneg %p653_p1 }
  0x83   : > { %p659_p0 = pnand %p658_p8, %p654_p2 }
  0x85   : > { %662 = shalt.err (!%p659_p0)
}
  0x86   : > { %s729_s28 = smov 16   ;;  %s730_s29 = smov 1  }
  0x87   : > { %501 = dma.vmem_to_hbm [thread:$0]  (%p797_p9), %s898_s3, 64, %s896_s30, %s339_s4, %s729_s28, %s729_s28, %s730_s29  }
  0x88 PF: > { %s369_s21 = sand.u32 1, %s701_s9   ;;  %p956_p3 = scmp.ge.s32.totalorder %s721_s14, 2 }
  0x89   : > { %s370_s7 = scalar_lea.sflag [#allocation4], %s369_s21 }
  0x8a   : > { %p511_p13 = pnand %p956_p3, %p804_p11 }
  0x8c   : > { %p512_p5 = pneg %p511_p13 }
  0x8e   : > { %696 = dma.done.wait (%p512_p5), %s370_s7, 64  }
  0x8f   : > { %698 = vsyncadd (%p512_p5), %s370_s7, 4294967232  ;;  %s21_s14 = sadd.s32 1, %s721_s14   ;;  %s957_s9 = smov %s705_s10 }
  0x90   : > { %p18_p12 = scmp.ge.s32.totalorder %s21_s14, 4   ;;  %s958_s10 = smov %s709_s11 }
  0x91   : > { %s959_s11 = smov %s802_s23  ;;  %s960_s12 = smov %s717_s13 }
  0x92   : > { %s961_s13 = smov %s963_s17  ;;  %20 = sbr.rel (!%p18_p12) target bundleno = 8 (0x8), region = 94 }
  0x97   :  { %375 = vsyncpa [#allocation3], 1 }
  0x98   :  { %377 = vsyncpa [#allocation3 + $0x1], 1 }
  0x99   :  { %378 = vsyncpa [#allocation6], 1 }
  0x9a   :  { %380 = vsyncpa [#allocation6 + $0x1], 1 }
  0x9b   :  { %381 = vsyncpa [#allocation4], 1 }
  0x9c   :  { %383 = vsyncpa [#allocation4 + $0x1], 1 }

</bundles_post_ra>
